<compile_context>
chip_gen: v5e
topology: v5e:2x2
jax: 0.10.0
libtpu: 0.0.40
codegen_flags: <defaults>
</compile_context>

<pallas_src>
import functools
import math

import jax
import jax.numpy as jnp
from jax.experimental import pallas as pl
from jax.experimental.pallas import tpu as pltpu

_LANES = 128

# Primitives whose output element [i] depends only on input element [i].
# Anything outside this set (or a non-scalar broadcast) makes the lambda
# ineligible for the tiled slab kernel -> plain-XLA fallback (always exact).
_ELEMENTWISE_PRIMS = frozenset({
    "add", "sub", "mul", "div", "rem", "max", "min", "pow", "integer_pow",
    "neg", "abs", "sign", "square", "exp", "exp2", "expm1", "log", "log1p",
    "sqrt", "rsqrt", "cbrt", "logistic", "tanh", "sin", "cos", "tan",
    "asin", "acos", "atan", "atan2", "sinh", "cosh", "asinh", "acosh",
    "atanh", "erf", "erfc", "erf_inv", "floor", "ceil", "round",
    "nextafter", "is_finite", "not", "and", "or", "xor",
    "eq", "ne", "lt", "le", "gt", "ge", "select_n", "clamp",
    "shift_left", "shift_right_logical", "shift_right_arithmetic",
    "convert_element_type", "copy", "real", "imag", "conj", "stop_gradient",
})

_TRANSCENDENTAL_PRIMS = frozenset({
    "exp", "exp2", "expm1", "log", "log1p", "logistic", "tanh", "sin", "cos",
    "tan", "asin", "acos", "atan", "atan2", "sinh", "cosh", "asinh", "acosh",
    "atanh", "erf", "erfc", "erf_inv", "pow", "rsqrt", "sqrt", "cbrt",
})

_CALL_JAXPR_PARAM_KEYS = ("jaxpr", "call_jaxpr", "fun_jaxpr")


def _sublane_multiple(dtype):
    # Minimum second-minor tile multiple on TPU: 8 for 4-byte dtypes,
    # 16 for 2-byte (bf16/f16), 32 for 1-byte (int8/fp8).
    return max(8, 32 // jnp.dtype(dtype).itemsize)


def _walk_jaxpr(jaxpr):
    """Return (is_elementwise, n_arith_eqns, n_transcendental_eqns)."""
    arith = 0
    transc = 0
    for eqn in jaxpr.eqns:
        name = eqn.primitive.name
        if name in _ELEMENTWISE_PRIMS:
            arith += 1
            if name in _TRANSCENDENTAL_PRIMS:
                transc += 1
            continue
        if name == "broadcast_in_dim":
            # Broadcasting a scalar constant is fine; a non-scalar operand
            # would make results depend on the slab re-tiling -> reject.
            aval = eqn.invars[0].aval
            shape = tuple(getattr(aval, "shape", (2,)))
            if math.prod(shape) <= 1:
                continue
            return False, arith, transc
        # Recurse into call-like primitives (pjit, custom_jvp_call, remat...).
        sub = None
        for key in _CALL_JAXPR_PARAM_KEYS:
            if key in eqn.params:
                sub = eqn.params[key]
                break
        if sub is not None:
            inner = sub.jaxpr if hasattr(sub, "jaxpr") else sub
            ok, a, t = _walk_jaxpr(inner)
            arith += a
            transc += t
            if ok:
                continue
        return False, arith, transc
    return True, arith, transc


def _analyze_lambda(lambd, in_dtype):
    """Probe lambd abstractly. Returns (out_dtype, arith/elem, transc/elem)
    when it is provably element-wise and shape-preserving, else None."""
    probe = jax.ShapeDtypeStruct((8, _LANES), jnp.dtype(in_dtype))
    try:
        out = jax.eval_shape(lambd, probe)
    except Exception:
        return None
    if not (hasattr(out, "shape") and tuple(out.shape) == probe.shape):
        return None
    try:
        closed = jax.make_jaxpr(lambd)(probe)
    except Exception:
        try:
            closed = jax.make_jaxpr(lambd)(jnp.ones(probe.shape, probe.dtype))
        except Exception:
            return None
    ok, arith, transc = _walk_jaxpr(closed.jaxpr)
    if not ok:
        return None
    return jnp.dtype(out.dtype), int(arith), int(transc)


def _lambda_kernel(x_ref, o_ref, *, lambd):
    # Pure element-wise map on the current VMEM tile (VPU/EUP work).
    o_ref[...] = lambd(x_ref[...]).astype(o_ref.dtype)


def _run_slab(slab, lambd, out_dtype, sub, tr_target, arith_per_elem,
              transc_per_elem, donate):
    """Tiled element-wise map over a lane-dense (rows, 128) slab."""
    rows = slab.shape[0]
    in_item = jnp.dtype(slab.dtype).itemsize
    out_item = jnp.dtype(out_dtype).itemsize

    if rows > tr_target:
        # Large tensor: fixed big tile; Pallas masks the partial last block.
        tr = tr_target
    elif rows >= 2 * sub:
        # Medium tensor: split into >=2 blocks so the "parallel" grid axis can
        # be sharded across both TensorCores on v7x (no cost on v5e/v6e).
        half = (rows + 1) // 2
        tr = ((half + sub - 1) // sub) * sub
    else:
        # Tiny slab: single full-extent block (no (8,128) alignment needed).
        tr = rows
    grid = (pl.cdiv(rows, tr),)

    # in + out, double-buffered, plus headroom; capped to stay well inside
    # v7x's 64 MiB physical VMEM (v5e/v6e have 128 MiB).
    block_bytes = tr * _LANES * (in_item + out_item)
    vmem_limit = min(56 * 1024 * 1024, 2 * block_bytes + 8 * 1024 * 1024)

    n_elems = rows * _LANES
    cost = pl.CostEstimate(
        flops=max(1, arith_per_elem) * n_elems,
        transcendentals=transc_per_elem * n_elems,
        bytes_accessed=n_elems * (in_item + out_item),
    )

    extra = {}
    if donate and slab.dtype == jnp.dtype(out_dtype):
        # Output reuses the input buffer: no bandwidth change, but halves the
        # peak HBM footprint when the caller can donate x.
        extra["input_output_aliases"] = {0: 0}

    return pl.pallas_call(
        functools.partial(_lambda_kernel, lambd=lambd),
        out_shape=jax.ShapeDtypeStruct((rows, _LANES), out_dtype),
        grid_spec=pltpu.PrefetchScalarGridSpec(
            num_scalar_prefetch=0,
            grid=grid,
            in_specs=[pl.BlockSpec((tr, _LANES), lambda i: (i, 0))],
            out_specs=pl.BlockSpec((tr, _LANES), lambda i: (i, 0)),
        ),
        compiler_params=pltpu.CompilerParams(
            dimension_semantics=("parallel",),
            vmem_limit_bytes=vmem_limit,
        ),
        cost_estimate=cost,
        **extra,
    )(slab)


def pallas_lambda(lambd, *, target_block_bytes=8 * 1024 * 1024,
                  small_bypass_bytes=256 * 1024, donate_input=False):
    """Return a function equivalent to Lambda(lambd).forward.

    Provably element-wise lambdas run through a tiled Pallas TPU kernel;
    everything else falls back to plain XLA so the original nn.Module
    semantics are always preserved.
    """
    analysis_cache = {}

    def apply(x):
        orig_shape = x.shape
        in_dtype = jnp.dtype(x.dtype)
        n = x.size

        if n == 0:
            return lambd(x)

        key = str(in_dtype)
        if key not in analysis_cache:
            analysis_cache[key] = _analyze_lambda(lambd, in_dtype)
        info = analysis_cache[key]
        if info is None:
            # TODO(synk): non element-wise / shape-changing lambdas have no
            # generic Pallas mapping; apply plain XLA (exact semantics).
            return lambd(x)
        out_dtype, arith, transc = info

        # Small-input bypass: pallas_call launch / pipeline-priming overhead
        # dominates tiny tensors; plain XLA is strictly faster there.
        if n * in_dtype.itemsize <= small_bypass_bytes:
            return lambd(x)

        # Dtype-aware tile sizing: ~target_block_bytes per buffer, rows a
        # multiple of the per-dtype sublane minimum.
        sub = max(_sublane_multiple(in_dtype), _sublane_multiple(out_dtype))
        max_item = max(in_dtype.itemsize, jnp.dtype(out_dtype).itemsize)
        tr_target = max(sub, (target_block_bytes // (_LANES * max_item))
                        // sub * sub)

        n_main = (n // _LANES) * _LANES
        if n_main == n:
            # Fast path (typical TFGridNet case): pure reshape, no extra HBM
            # traffic.
            slab = jnp.reshape(x, (-1, _LANES))
            out = _run_slab(slab, lambd, out_dtype, sub, tr_target,
                            arith, transc, donate_input)
            return jnp.reshape(out, orig_shape)

        if n_main == 0:
            return lambd(x)

        # Unaligned tail (< 128 elements): kernel handles the 128-aligned
        # prefix, the tiny tail goes through plain XLA; one stitch instead of
        # a full-tensor pad + slice round trip.
        flat = jnp.reshape(x, (-1,))
        main = jnp.reshape(jax.lax.slice(flat, (0,), (n_main,)), (-1, _LANES))
        out_main = _run_slab(main, lambd, out_dtype, sub, tr_target,
                             arith, transc, donate_input)
        tail_out = lambd(jax.lax.slice(flat, (n_main,), (n,)))
        out_flat = jnp.concatenate(
            [jnp.reshape(out_main, (-1,)), tail_out.astype(out_dtype)])
        return jnp.reshape(out_flat, orig_shape)

    return apply


if __name__ == "__main__":
    # Representative element-wise lambda as used inside TFGridNet-style nets
    # (SiLU-like gate): lambda x: x * sigmoid(x)
    lambd = lambda t: t * jax.nn.sigmoid(t)

    key = jax.random.PRNGKey(0)

    # Sanity: the analyser accepts the element-wise lambda (Pallas path is
    # genuinely exercised below, not silently falling back).
    assert _analyze_lambda(lambd, jnp.float32) is not None

    # 1) Small NCHW input consistent with the module usage (B, C, H, W).
    #    Goes through the small-input bypass (semantically identical).
    x = jax.random.normal(key, (2, 4, 16, 16), dtype=jnp.float32)
    y = jax.block_until_ready(pallas_lambda(lambd)(x))
    assert y.shape == x.shape and y.dtype == x.dtype
    assert jnp.allclose(y, lambd(x), atol=1e-6, rtol=1e-6)

    # 2) Force the Pallas kernel path on the same small, lane-aligned input
    #    (rows=16 -> 2 grid steps so both v7x TensorCores would get work).
    apply_kernel = pallas_lambda(lambd, small_bypass_bytes=0)
    y2 = jax.block_until_ready(apply_kernel(x))
    assert y2.shape == x.shape and y2.dtype == x.dtype
    assert jnp.allclose(y2, lambd(x), atol=1e-6, rtol=1e-6)

    # 3) Non-128-divisible shape: aligned prefix via Pallas + tiny XLA tail.
    x3 = jax.random.normal(jax.random.PRNGKey(0), (3, 5, 7, 11),
                           dtype=jnp.float32)
    y3 = jax.block_until_ready(apply_kernel(x3))
    assert y3.shape == x3.shape and y3.dtype == x3.dtype
    assert jnp.allclose(y3, lambd(x3), atol=1e-6, rtol=1e-6)

    # 4) Larger tensor exercising big tiles + a multi-step ("parallel") grid.
    x4 = jax.random.normal(key, (4, 64, 32, 128), dtype=jnp.float32)  # 4 MiB
    y4 = jax.block_until_ready(apply_kernel(x4))
    assert y4.shape == x4.shape and y4.dtype == x4.dtype
    assert jnp.allclose(y4, lambd(x4), atol=1e-6, rtol=1e-6)

    # 5) bf16 input exercising the dtype-aware sublane multiple (16).
    x5 = jax.random.normal(key, (4, 8, 16, 64), dtype=jnp.bfloat16)
    y5 = jax.block_until_ready(apply_kernel(x5))
    assert y5.shape == x5.shape and y5.dtype == x5.dtype
    assert jnp.allclose(y5.astype(jnp.float32), lambd(x5).astype(jnp.float32),
                        atol=1e-2, rtol=1e-2)

    # 6) Non element-wise lambda (shape-preserving but tile-order dependent):
    #    the jaxpr check rejects it and the exact XLA fallback is used.
    flip_lambd = lambda t: jnp.flip(t, axis=-1)
    y6 = jax.block_until_ready(
        pallas_lambda(flip_lambd, small_bypass_bytes=0)(x))
    assert jnp.array_equal(y6, jnp.flip(x, axis=-1))

    # 7) Input/output aliasing path (opt-in): halves peak HBM footprint.
    x7 = jax.random.normal(key, (4, 64, 32, 128), dtype=jnp.float32)
    ref7 = lambd(x7)
    y7 = jax.block_until_ready(
        pallas_lambda(lambd, small_bypass_bytes=0, donate_input=True)(x7))
    assert y7.shape == x7.shape and y7.dtype == x7.dtype
    assert jnp.allclose(y7, ref7, atol=1e-6, rtol=1e-6)

    print("KERNEL_OK")
</pallas_src>

<mosaic_0001>
module attributes {stable_mosaic.version = 11 : i64} {
  func.func @_lambda_kernel(%arg0: i32, %arg1: memref<8x128xf32, #tpu.memory_space<vmem>>, %arg2: memref<8x128xf32, #tpu.memory_space<vmem>>) attributes {dimension_semantics = [#tpu.dimension_semantics<parallel>], iteration_bounds = array<i64: 2>, scalar_prefetch = 0 : i64, scratch_operands = 0 : i64, tpu.core_type = #tpu.core_type<tc>, window_params = [{transform_indices = @transform_0, window_bounds = array<i64: 8, 128>}, {transform_indices = @transform_1, window_bounds = array<i64: 8, 128>}]} {
    %c0 = arith.constant 0 : index
    %c0_0 = arith.constant 0 : index
    %0 = vector.load %arg1[%c0, %c0_0] : memref<8x128xf32, #tpu.memory_space<vmem>>, vector<8x128xf32>
    %1 = arith.negf %0 : vector<8x128xf32>
    %2 = math.exp %1 : vector<8x128xf32>
    %cst = arith.constant 1.000000e+00 : f32
    %3 = vector.broadcast %cst : f32 to vector<8x128xf32>
    %4 = arith.addf %3, %2 : vector<8x128xf32>
    %5 = arith.divf %3, %4 : vector<8x128xf32>
    %6 = arith.mulf %0, %5 : vector<8x128xf32>
    %c0_1 = arith.constant 0 : index
    %c0_2 = arith.constant 0 : index
    %7 = vector.load %arg2[%c0_1, %c0_2] : memref<8x128xf32, #tpu.memory_space<vmem>>, vector<8x128xf32>
    tpu.vector_store %arg2[%c0_1, %c0_2], %6 {strides = array<i32>} : memref<8x128xf32, #tpu.memory_space<vmem>>, vector<8x128xf32>,
    return
  }
  func.func @transform_0(%arg0: i32) -> (i32, i32) {
    %c0_i32 = arith.constant 0 : i32
    %c0_i32_0 = arith.constant 0 : i32
    return %arg0, %c0_i32 : i32, i32
  }
  func.func @transform_1(%arg0: i32) -> (i32, i32) {
    %c0_i32 = arith.constant 0 : i32
    %c0_i32_0 = arith.constant 0 : i32
    return %arg0, %c0_i32 : i32, i32
  }
}

</mosaic_0001>

<bundles_post_ra>
// kernel: tpu_custom_call.1
= control target key start
LH: loop header
LB: loop body
LE: loop exit
PB: predicated region body
PF: predicated region fallthrough
CT: control target
= control target key end

     0   :  { %6 = vsyncpa [#allocation3], 0  ;;  %s540_s0 = inlined_call_operand.hbm [shape: f32[16,128], index: 0, kind: input, shape index: {}]   ;;  %s541_s1 = inlined_call_operand.hbm [shape: f32[16,128], index: 1, kind: output, shape index: {}]  }
   0x1   :  { %8 = vsyncpa [#allocation3 + $0x1], 0 }
   0x2   :  { %9 = vsyncpa [#allocation4], 0 }
   0x3   :  { %11 = vsyncpa [#allocation4 + $0x1], 0  ;;  %s413_s6 = smov 0   ;;  %s415_s7 = smov 0  }
   0x4   :  { %s417_s8 = smov 0   ;;  %s419_s9 = smov 0  }
   0x5 LB: > { %s434_s10 = sadd.s32 4294967295, %s401_s9   ;;  %s242_s11 = sadd.s32 4294967294, %s401_s9   ;;  %s401_s9 = sphi %s419_s9, %s551_s9   ;;  %s397_s8 = sphi %s417_s8, %s550_s8   ;;  %s393_s7 = sphi %s415_s7, %s549_s7   ;;  %s389_s6 = sphi %s413_s6, %s548_s6  }
   0x6   : > { %s438_s12 = sadd.s32 1, %s401_s9   ;;  %s24_s13 = sadd.s32 1, %s397_s8 }
   0x7   : > { %s21_s14 = ssub.s32 %s401_s9, %s438_s12  ;;  %p31_p0 = scmp.ne.s32.totalorder %s397_s8, %s393_s7 }
   0x8   : > { %p22_p1 = scmp.eq.s32.totalorder %s21_s14, 0  ;;  %p32_p2 = scmp.eq.s32.totalorder %s401_s9, 0 }
   0x9   : > { %p37_p3 = scmp.ne.s32.totalorder %s393_s7, %s389_s6  ;;  %p38_p4 = scmp.eq.s32.totalorder %s434_s10, 0 }
   0xa   : > { %s450_s15 = scalar_select %p22_p1, %s397_s8, %s24_s13  }
   0xb   : > { %p452_p5 = por %p32_p2, %p31_p0  ;;  %p456_p6 = por %p38_p4, %p37_p3 }
   0xc   : > { %p61_p7 = scmp.eq.s32.totalorder %s434_s10, 1  ;;  %p67_p8 = scmp.eq.s32.totalorder %s242_s11, 1 }
   0xd   : > { %p267_p10 = scmp.lt.s32.totalorder %s401_s9, 2  ;;  %s87_s20 = sand.u32 1, %s397_s8  }
   0xe   : > { %p463_p11 = por %p61_p7, %p31_p0  ;;  %p467_p12 = por %p67_p8, %p37_p3 }
   0xf   : > { %s246_s21 = sshll.u32 %s401_s9, 3  ;;  %s245_s22 = sshll.u32 %s87_s20, 3 }
  0x10   : > { %s95_s25 = scalar_lea.hbm %s540_s0, %s246_s21  ;;  %s91_s27 = scalar_lea.vmem [#allocation2], %s245_s22 }
  0x11   : > { %s97_s26 = sshll.u32 %s95_s25, 4  ;;  %s99_s28 = sshll.u32 %s91_s27, 4  ;;  %s98_s26 = int_to_ptr.hbm [resolvable:$true] %s97_s26  ;;  %s100_s28 = int_to_ptr.vmem [resolvable:$true] %s99_s28 }
  0x12   : > { %p478_p13 = pnand %p267_p10, %p452_p5  ;;  %p247_p0 = scmp.ge.s32.totalorder %s401_s9, 1 }
  0x13   : > { %p104_p1 = scmp.lt.s32.totalorder %s401_s9, 3  ;;  %s88_s30 = scalar_lea.sflag [#allocation3], %s87_s20 }
  0x14   : > { %s305_s2 = sshra.s32 %s98_s26, 4  ;;  %p309_p3 = pneg %p478_p13  ;;  %s306_s2 = int_to_ptr.hbm [resolvable:$true] %s305_s2 }
  0x15   : > { %s307_s3 = scalar_lea.hbm %s306_s2, 8  ;;  %s312_s11 = scalar_lea.hbm %s540_s0, 16 }
  0x16   : > { %p308_p2 = scmp.ne.s32.totalorder %s306_s2, %s307_s3  ;;  %p313_p5 = scmp.lt.s32.totalorder %s306_s2, %s540_s0 }
  0x17   : > { %p314_p8 = scmp.lt.s32.totalorder %s312_s11, %s307_s3 }
  0x18   : > { %p310_p4 = pnand %p309_p3, %p308_p2 }
  0x19   : > { %p315_p10 = por %p314_p8, %p313_p5 }
  0x1a   : > { %p311_p7 = pneg %p310_p4 }
  0x1c   : > { %p316_p9 = pnand %p315_p10, %p311_p7 }
  0x1e   : > { %319 = shalt.err (!%p316_p9)
}
  0x1f   : > { %262 = dma.hbm_to_vmem [thread:$0]  (!%p478_p13), %s98_s26, 128, %s100_s28, %s88_s30  }
  0x20   : > { %p105_p2 = pnand %p247_p0, %p104_p1 }
  0x21   : > { %s499_s16 = sand.u32 (!%p105_p2), 1, %s393_s7  }
  0x22   : > { %108 = sbr.rel (%p105_p2) target bundleno = 74 (0x4a), region = 24  ;;  %s248_s20 = sshll.u32 (!%p105_p2), %s499_s16, 3 }
  0x23   : > { %s111_s21 = scalar_lea.sflag (!%p105_p2), [#allocation3], %s499_s16  ;;  %s114_s22 = scalar_lea.vmem (!%p105_p2), [#allocation2], %s248_s20 }
  0x27   : > { %380 = dma.done.wait (%p456_p6), %s111_s21, 128  }
  0x28   : > { %382 = vsyncadd (%p456_p6), %s111_s21, 4294967168  ;;  %v134_v0 = vld [vmem:[%s114_s22] sm:$0xff]  ;;  %s252_s23 = sshll.u32 %s434_s10, 3  ;;  %s133_s26 = scalar_lea.vmem [#allocation5], %s248_s20 }
  0x29   : > { %v250_v1 = vmul.f32 -1.442695, %v134_v0  ;;  %s167_s25 = scalar_lea.hbm %s541_s1, %s252_s23  ;;  %s169_s27 = sshll.u32 %s133_s26, 4  ;;  %s170_s27 = int_to_ptr.vmem [resolvable:$true] %s169_s27 }
  0x2a   : > { %s171_s28 = sshll.u32 %s167_s25, 4  ;;  %s157_s10 = scalar_lea.sflag [#allocation4], %s499_s16  ;;  %s172_s28 = int_to_ptr.hbm [resolvable:$true] %s171_s28 }
  0x2b   : > { %301 = vpow2.f32 %v250_v1  ;;  %s349_s29 = sshra.s32 %s172_s28, 4  ;;  %s355_s4 = scalar_lea.hbm %s541_s1, 16  ;;  %s350_s29 = int_to_ptr.hbm [resolvable:$true] %s349_s29 }
  0x2c   : > { %s351_s30 = scalar_lea.hbm %s350_s29, 8  ;;  %p356_p0 = scmp.lt.s32.totalorder %s350_s29, %s541_s1 }
  0x2d   : > { %p352_p6 = scmp.ne.s32.totalorder %s350_s29, %s351_s30  ;;  %p357_p1 = scmp.lt.s32.totalorder %s355_s4, %s351_s30 }
  0x2f   : > { %p353_p9 = pnand %p352_p6, %p463_p11  ;;  %p358_p3 = por %p357_p1, %p356_p0 }
  0x31   : > { %v302_v2 = vpop.eup %301  ;;  %p354_p13 = pneg %p353_p9 }
  0x32   : > { %v138_v3 = vadd.f32 1.0, %v302_v2 }
  0x33   : > { %p359_p4 = pnand %p358_p3, %p354_p13 }
  0x34   : > { %303 = vrcp.f32 %v138_v3  ;;  %v150_v6 = vand.u32 2147483648, %v138_v3  ;;  %vm144_vm0 = vweird.f32 %v138_v3  ;;  %v148_v8 = vand.u32 2147483647, %v138_v3 }
  0x36   : > { %v151_v10 = vor.u32 1.1754944e-38, %v150_v6  ;;  %vm149_vm3 = vcmp.eq.f32.partialorder %v148_v8, 8.507059e+37 }
  0x3a   : > { %v304_v4 = vpop.eup %303 }
  0x3b   : > { %v140_v5 = vmul.f32 %v304_v4, %v138_v3  ;;  %vm145_vm1 = vweird.f32 %v304_v4 }
  0x3c   : > { %vm146_vm2 = vmor %vm144_vm0, %vm145_vm1 }
  0x3d   : > { %v141_v7 = vsub.f32 1.0, %v140_v5 }
  0x3f   : > { %v142_v9 = vmul.f32 %v304_v4, %v141_v7 }
  0x41   : > { %v143_v11 = vadd.f32 %v304_v4, %v142_v9 }
  0x43   : > { %v147_v12 = vsel %vm146_vm2, %v304_v4, %v143_v11 }
  0x44   : > { %v152_v13 = vsel %vm149_vm3, %v151_v10, %v147_v12 }
  0x45   : > { %v154_v14 = vmul.f32 %v152_v13, %v134_v0 }
  0x47   : > { %155 = vst [vmem:[%s133_s26] sm:$0xff] %v154_v14 }
  0x48   : > { %362 = shalt.err (!%p359_p4)
}
  0x49   : > { %257 = dma.vmem_to_hbm [thread:$0]  (%p463_p11), %s170_s27, 128, %s172_s28, %s157_s10  }
  0x4a PF: > { %s183_s13 = sand.u32 1, %s389_s6   ;;  %p547_p7 = scmp.ge.s32.totalorder %s401_s9, 2 }
  0x4b   : > { %s184_s14 = scalar_lea.sflag [#allocation4], %s183_s13 }
  0x4c   : > { %p264_p5 = pnand %p547_p7, %p467_p12 }
  0x4e   : > { %p265_p8 = pneg %p264_p5 }
  0x50   : > { %384 = dma.done.wait (%p265_p8), %s184_s14, 128  }
  0x51   : > { %386 = vsyncadd (%p265_p8), %s184_s14, 4294967168  ;;  %p14_p10 = scmp.ge.s32.totalorder %s438_s12, 4   ;;  %s548_s6 = smov %s393_s7 }
  0x52   : > { %s549_s7 = smov %s397_s8  ;;  %s550_s8 = smov %s450_s15 }
  0x53   : > { %s551_s9 = smov %s438_s12  ;;  %16 = sbr.rel (!%p14_p10) target bundleno = 5 (0x5), region = 69 }
  0x58   :  { %190 = vsyncpa [#allocation3], 1 }
  0x59   :  { %192 = vsyncpa [#allocation3 + $0x1], 1 }
  0x5a   :  { %193 = vsyncpa [#allocation4], 1 }
  0x5b   :  { %195 = vsyncpa [#allocation4 + $0x1], 1 }

</bundles_post_ra>
